<compile_context>
chip_gen: v6e
topology: v6e:2x2x1
jax: 0.10.0
libtpu: 0.0.40
codegen_flags: <defaults>
</compile_context>

<pallas_src>
import functools
import math

import jax
import jax.numpy as jnp
from jax.experimental import pallas as pl
from jax.experimental.pallas import tpu as pltpu


def _label_smoothing_kernel(x_ref, tgt_ref, o_ref, *, on_val, off_val,
                            n_total, v_total, tile_n, tile_v):
    """Accumulate sum_{(n,c) in tile} t(n,c)*x(n,c) into this N-tile's (8,128) slab."""
    i = pl.program_id(0)          # N-tile index ("parallel" -> megacore shards this axis)
    j = pl.program_id(1)          # V-tile index (reduction axis, last in the grid)

    x = x_ref[...].astype(jnp.float32)           # (tile_n, tile_v), up-cast in-register
    tgt = tgt_ref[...]                           # (tile_n, 1) int32, resident across V

    # Scatter test as a local lane iota vs (target - j*tile_v): avoids adding j*tile_v
    # across the full (tile_n, tile_v) tile.
    col = jax.lax.broadcasted_iota(jnp.int32, (tile_n, tile_v), 1)
    match = col == (tgt - j * tile_v)

    # Tail masking: generated only when the dims don't divide the tiles (trace-time
    # flags).  The mask is applied to x (not the product) so a zero coefficient times
    # garbage (-inf / NaN) in the out-of-bounds region can never leak a NaN.
    n_rem = n_total % tile_n
    v_rem = v_total % tile_v
    if n_rem or v_rem:
        valid = None
        if v_rem:
            valid = col < (v_total - j * tile_v)
        if n_rem:
            row = jax.lax.broadcasted_iota(jnp.int32, (tile_n, tile_v), 0)
            rmask = row < (n_total - i * tile_n)
            valid = rmask if valid is None else (valid & rmask)
        x = jnp.where(valid, x, jnp.float32(0.0))

    # Weighted contribution.  Specialize the zero-coefficient cases (smoothing == 0 / 1)
    # so 0 * (-inf log-prob) never produces NaN (reference masks those terms via t > 0).
    on = jnp.float32(on_val)
    off = jnp.float32(off_val)
    if off_val == 0.0:
        contrib = jnp.where(match, on * x, jnp.float32(0.0))
    elif on_val == 0.0:
        contrib = jnp.where(match, jnp.float32(0.0), off * x)
    else:
        contrib = jnp.where(match, on, off) * x

    # Reduce the tile to a lane-dense (8, 128) partial-sum slab using only vreg-aligned
    # elementwise adds (no cross-lane/sublane reduce, no scalar->slab broadcast).
    if tile_n % 8 == 0 and tile_v % 128 == 0:
        part = contrib[0:8, :]
        for a in range(1, tile_n // 8):                 # fold sublane groups
            part = part + contrib[a * 8:(a + 1) * 8, :]
        slab = part[:, 0:128]
        for b in range(1, tile_v // 128):               # fold lane groups
            slab = slab + part[:, b * 128:(b + 1) * 128]
    else:
        # Small / oddly-shaped single-tile fallback: full reduce into element (0, 0).
        s = jnp.sum(contrib)
        r = jax.lax.broadcasted_iota(jnp.int32, (8, 128), 0)
        c = jax.lax.broadcasted_iota(jnp.int32, (8, 128), 1)
        slab = jnp.where((r == 0) & (c == 0), s, jnp.float32(0.0))

    # Output block is resident across the V axis: store on the first V step, add after.
    @pl.when(j == 0)
    def _():
        o_ref[...] = slab

    @pl.when(j != 0)
    def _():
        o_ref[...] += slab


def _xlogx(p):
    return 0.0 if p <= 0.0 else p * math.log(p)


def label_smoothing_loss(x, target, smoothing=0.0, *, tile_n=256, tile_v=4096):
    """Pallas equivalent of LabelSmoothing(size=x.shape[1], smoothing).forward(x, target)."""
    assert x.ndim == 2
    n, v = x.shape
    assert target.shape == (n,)

    on_val = 1.0 - float(smoothing)
    off_val = float(smoothing) / (v - 1) if v > 1 else 0.0

    # sum_{n,c} t*log(t) is a compile-time constant; _xlogx guards smoothing == 0 / 1
    # (0*log 0 := 0, matching KLDivLoss's where(t > 0, ...)).
    const_term = n * (_xlogx(on_val) + (v - 1) * _xlogx(off_val))

    # Tile selection: full-dim blocks when a dim is small (always legal), otherwise
    # (8,128)-aligned tiles.  When N fits a single tile but is large enough, split it in
    # two so the "parallel" axis can shard across both v7x TensorCores.
    if n > tile_n:
        tn = tile_n
    elif n >= 16:
        tn = ((n + 1) // 2 + 7) // 8 * 8
    else:
        tn = n
    tv = v if v <= tile_v else tile_v
    grid = (pl.cdiv(n, tn), pl.cdiv(v, tv))

    tgt2d = target.astype(jnp.int32).reshape(n, 1)

    # One lane-dense (8, 128) partial-sum slab per N tile.
    out_shape = jax.ShapeDtypeStruct((grid[0] * 8, 128), jnp.float32)

    x_block_bytes = 2 * tn * tv * x.dtype.itemsize          # double-buffered input blocks
    vmem_limit = int(min(max(32 << 20, x_block_bytes + (8 << 20)), 64 << 20))

    partials = pl.pallas_call(
        functools.partial(_label_smoothing_kernel, on_val=on_val, off_val=off_val,
                          n_total=n, v_total=v, tile_n=tn, tile_v=tv),
        out_shape=out_shape,
        grid=grid,
        in_specs=[
            pl.BlockSpec((tn, tv), lambda i, j: (i, j)),     # x streamed in native dtype
            pl.BlockSpec((tn, 1), lambda i, j: (i, 0)),      # target resident across V
        ],
        out_specs=pl.BlockSpec((8, 128), lambda i, j: (i, 0)),
        compiler_params=pltpu.CompilerParams(
            dimension_semantics=("parallel", "arbitrary"),
            vmem_limit_bytes=vmem_limit),
        cost_estimate=pl.CostEstimate(
            flops=3 * n * v,
            transcendentals=0,
            bytes_accessed=n * v * x.dtype.itemsize + n * 4 + grid[0] * 8 * 128 * 4),
    )(x, tgt2d)

    weighted = jnp.sum(partials)                  # = sum_{n,c} t(n,c) * x(n,c)
    return jnp.float32(const_term) - weighted


if __name__ == "__main__":
    def reference(x, target, smoothing):
        nn, vv = x.shape
        xf = x.astype(jnp.float32)
        on = 1.0 - smoothing
        off = smoothing / (vv - 1)
        t = jnp.where(jnp.arange(vv)[None, :] == target[:, None], on, off).astype(jnp.float32)
        return jnp.sum(jnp.where(t > 0, t * (jnp.log(jnp.maximum(t, 1e-30)) - xf), 0.0))

    smoothing = 0.1
    key = jax.random.PRNGKey(0)

    # Case 1: small shapes consistent with the module (single-tile fallback path).
    k1a, k1b = jax.random.split(key)
    N, V = 8, 32
    x1 = jax.nn.log_softmax(jax.random.normal(k1a, (N, V), dtype=jnp.float32), axis=-1)
    t1 = jax.random.randint(k1b, (N,), 0, V, dtype=jnp.int32)
    loss1 = label_smoothing_loss(x1, t1, smoothing=smoothing)
    jax.block_until_ready(loss1)
    assert jnp.allclose(loss1, reference(x1, t1, smoothing), rtol=1e-4, atol=1e-3)

    # Case 2: non-aligned shapes with a real multi-tile grid (vector-slab path with tail
    # masking on both axes, per-N-tile parallel outputs, V reduction).
    k2a, k2b = jax.random.split(jax.random.PRNGKey(1))
    N2, V2 = 20, 300
    x2 = jax.nn.log_softmax(jax.random.normal(k2a, (N2, V2), dtype=jnp.float32), axis=-1)
    t2 = jax.random.randint(k2b, (N2,), 0, V2, dtype=jnp.int32)
    loss2 = label_smoothing_loss(x2, t2, smoothing=smoothing, tile_n=8, tile_v=128)
    jax.block_until_ready(loss2)
    assert jnp.allclose(loss2, reference(x2, t2, smoothing), rtol=1e-4, atol=1e-3)

    # Case 3: divisible shapes -> clean hot path (no masks) + megacore N split (grid[0]=2).
    k3a, k3b = jax.random.split(jax.random.PRNGKey(2))
    N3, V3 = 64, 512
    x3 = jax.nn.log_softmax(jax.random.normal(k3a, (N3, V3), dtype=jnp.float32), axis=-1)
    t3 = jax.random.randint(k3b, (N3,), 0, V3, dtype=jnp.int32)
    loss3 = label_smoothing_loss(x3, t3, smoothing=smoothing)
    jax.block_until_ready(loss3)
    assert jnp.allclose(loss3, reference(x3, t3, smoothing), rtol=1e-4, atol=1e-2)

    # Case 4: bf16 log-probs streamed in native dtype (halves HBM traffic).
    x4 = x3.astype(jnp.bfloat16)
    loss4 = label_smoothing_loss(x4, t3, smoothing=smoothing)
    jax.block_until_ready(loss4)
    assert jnp.allclose(loss4, reference(x4, t3, smoothing), rtol=1e-4, atol=1e-2)

    # Case 5: smoothing == 0 with an exact -inf at a non-target class (zero-weight class);
    # the reference masks it via t > 0 and the kernel must not leak NaN.
    t5 = t1.at[0].set(3)
    x5 = x1.at[0, 4].set(-jnp.inf)
    loss5 = label_smoothing_loss(x5, t5, smoothing=0.0)
    jax.block_until_ready(loss5)
    ref5 = reference(x5, t5, 0.0)
    assert jnp.isfinite(loss5)
    assert jnp.allclose(loss5, ref5, rtol=1e-4, atol=1e-3)

    print("KERNEL_OK")
</pallas_src>

<mosaic_0001>
module attributes {stable_mosaic.version = 11 : i64} {
  func.func @_label_smoothing_kernel(%arg0: i32, %arg1: i32, %arg2: memref<8x32xf32, #tpu.memory_space<vmem>>, %arg3: memref<8x1xi32, #tpu.memory_space<vmem>>, %arg4: memref<8x128xf32, #tpu.memory_space<vmem>>) attributes {dimension_semantics = [#tpu.dimension_semantics<parallel>, #tpu.dimension_semantics<arbitrary>], iteration_bounds = array<i64: 1, 1>, scalar_prefetch = 0 : i64, scratch_operands = 0 : i64, tpu.core_type = #tpu.core_type<tc>, window_params = [{transform_indices = @transform_0, window_bounds = array<i64: 8, 32>}, {transform_indices = @transform_1, window_bounds = array<i64: 8, 1>}, {transform_indices = @transform_2, window_bounds = array<i64: 8, 128>}]} {
    %c0 = arith.constant 0 : index
    %c0_0 = arith.constant 0 : index
    %0 = vector.load %arg2[%c0, %c0_0] : memref<8x32xf32, #tpu.memory_space<vmem>>, vector<8x32xf32>
    %c0_1 = arith.constant 0 : index
    %c0_2 = arith.constant 0 : index
    %1 = vector.load %arg3[%c0_1, %c0_2] : memref<8x1xi32, #tpu.memory_space<vmem>>, vector<8x1xi32>
    %2 = tpu.iota {dimensions = array<i32: 1>} : vector<8x32xi32>
    %c32_i32 = arith.constant 32 : i32
    %3 = arith.muli %arg1, %c32_i32 : i32
    %4 = vector.broadcast %3 : i32 to vector<8x1xi32>
    %5 = arith.subi %1, %4 : vector<8x1xi32>
    %6 = vector.broadcast %5 : vector<8x1xi32> to vector<8x32xi32>
    %7 = arith.cmpi eq, %2, %6 : vector<8x32xi32>
    %cst = arith.constant 0.899999976 : f32
    %cst_3 = arith.constant 0.0032258064 : f32
    %8 = vector.broadcast %cst : f32 to vector<8x32xf32>
    %9 = vector.broadcast %cst_3 : f32 to vector<8x32xf32>
    %10 = arith.select %7, %8, %9 : vector<8x32xi1>, vector<8x32xf32>
    %11 = arith.mulf %10, %0 : vector<8x32xf32>
    %12 = vector.shape_cast %11 : vector<8x32xf32> to vector<1x8x32xf32>
    %cst_4 = arith.constant dense<0.000000e+00> : vector<1xf32>
    %13 = vector.multi_reduction <add>, %12, %cst_4 [1, 2] : vector<1x8x32xf32> to vector<1xf32>
    %14 = vector.shape_cast %13 : vector<1xf32> to vector<1x1x1xf32>
    %15 = vector.extract %14[0, 0, 0] : f32 from vector<1x1x1xf32>
    %16 = tpu.iota {dimensions = array<i32: 0>} : vector<8x128xi32>
    %17 = tpu.iota {dimensions = array<i32: 1>} : vector<8x128xi32>
    %c0_i32 = arith.constant 0 : i32
    %18 = vector.broadcast %c0_i32 : i32 to vector<8x128xi32>
    %19 = arith.cmpi eq, %16, %18 : vector<8x128xi32>
    %c0_i32_5 = arith.constant 0 : i32
    %20 = vector.broadcast %c0_i32_5 : i32 to vector<8x128xi32>
    %21 = arith.cmpi eq, %17, %20 : vector<8x128xi32>
    %22 = arith.andi %19, %21 : vector<8x128xi1>
    %cst_6 = arith.constant 0.000000e+00 : f32
    %23 = vector.broadcast %15 : f32 to vector<8x128xf32>
    %24 = vector.broadcast %cst_6 : f32 to vector<8x128xf32>
    %25 = arith.select %22, %23, %24 : vector<8x128xi1>, vector<8x128xf32>
    %c0_i32_7 = arith.constant 0 : i32
    %26 = arith.cmpi eq, %arg1, %c0_i32_7 : i32
    %27 = arith.extui %26 : i1 to i32
    %c0_i32_8 = arith.constant 0 : i32
    %28 = arith.cmpi ne, %27, %c0_i32_8 : i32
    scf.if %28 {
      %c0_11 = arith.constant 0 : index
      %c0_12 = arith.constant 0 : index
      %32 = vector.load %arg4[%c0_11, %c0_12] : memref<8x128xf32, #tpu.memory_space<vmem>>, vector<8x128xf32>
      tpu.vector_store %arg4[%c0_11, %c0_12], %25 {strides = array<i32>} : memref<8x128xf32, #tpu.memory_space<vmem>>, vector<8x128xf32>,
    } else {
    }
    %c0_i32_9 = arith.constant 0 : i32
    %29 = arith.cmpi ne, %arg1, %c0_i32_9 : i32
    %30 = arith.extui %29 : i1 to i32
    %c0_i32_10 = arith.constant 0 : i32
    %31 = arith.cmpi ne, %30, %c0_i32_10 : i32
    scf.if %31 {
      %c0_11 = arith.constant 0 : index
      %c0_12 = arith.constant 0 : index
      %32 = vector.load %arg4[%c0_11, %c0_12] : memref<8x128xf32, #tpu.memory_space<vmem>>, vector<8x128xf32>
      %33 = arith.addf %32, %25 : vector<8x128xf32>
      %c0_13 = arith.constant 0 : index
      %c0_14 = arith.constant 0 : index
      %34 = vector.load %arg4[%c0_13, %c0_14] : memref<8x128xf32, #tpu.memory_space<vmem>>, vector<8x128xf32>
      tpu.vector_store %arg4[%c0_13, %c0_14], %33 {strides = array<i32>} : memref<8x128xf32, #tpu.memory_space<vmem>>, vector<8x128xf32>,
    } else {
    }
    return
  }
  func.func @transform_0(%arg0: i32, %arg1: i32) -> (i32, i32) {
    %c0_i32 = arith.constant 0 : i32
    return %arg0, %arg1 : i32, i32
  }
  func.func @transform_1(%arg0: i32, %arg1: i32) -> (i32, i32) {
    %c0_i32 = arith.constant 0 : i32
    %c0_i32_0 = arith.constant 0 : i32
    return %arg0, %c0_i32 : i32, i32
  }
  func.func @transform_2(%arg0: i32, %arg1: i32) -> (i32, i32) {
    %c0_i32 = arith.constant 0 : i32
    %c0_i32_0 = arith.constant 0 : i32
    return %arg0, %c0_i32 : i32, i32
  }
}

</mosaic_0001>

<bundles_post_ra>
// kernel: tpu_custom_call.1
= control target key start
LH: loop header
LB: loop body
LE: loop exit
PB: predicated region body
PF: predicated region fallthrough
CT: control target
= control target key end

     0   :  { %v97_v1 = vmov 0   ;;  %s124_s0 = inlined_call_operand.vmem [shape: f32[8,32], index: 0, kind: input, shape index: {}]   ;;  %s125_s1 = inlined_call_operand.vmem [shape: s32[8,1], index: 1, kind: input, shape index: {}]   ;;  %s126_s2 = inlined_call_operand.hbm [shape: f32[8,128], index: 2, kind: output, shape index: {}]  }
   0x1   :  { %v13_v0 = vld [vmem:[%s125_s1] sm:$0xff]  ;;  %74 = vset.pattern.permute.xlu0 %v97_v1 }
   0x2   :  { %7 = vsyncpa [#allocation3], 0  ;;  %20 = vperm.xlu0 %74, %v13_v0   ;;  %v14_v2 = vlaneseq  ;;  %v12_v5 = vld [vmem:[%s124_s0] sm:$0xff]  ;;  %v98_v6 = vmov 0.0032258064   ;;  %vm25_vm1 = vcmask 261120  }
   0x3   :  { %s99_s1 = smov [#allocation2]  }
   0x4   :  { %v15_v3 = vand.u32 127, %v14_v2  ;;  %v37_v17 = vshrl.u32 %v14_v2, 7  ;;  %s61_s0 = sshll.u32 %s99_s1, 4  ;;  %s62_s0 = int_to_ptr.vmem [resolvable:$true] %s61_s0 }
   0x5   :  { %s75_s14 = scalar_lea.vmem %s62_s0, 128  ;;  %p80_p1 = scmp.lt.s32.totalorder %s62_s0, %s62_s0 }
   0x6   :  { %vm38_vm2 = vcmp.eq.s32.totalorder %v37_v17, 0  ;;  %vm39_vm3 = vcmp.eq.s32.totalorder %v15_v3, 0  ;;  %p76_p0 = scmp.ne.s32.totalorder %s62_s0, %s75_s14  ;;  %p81_p2 = scmp.lt.s32.totalorder %s75_s14, %s75_s14 }
   0x7   :  { %vm40_vm4 = vmand %vm38_vm2, %vm39_vm3 }
   0x8   :  { %p82_p3 = por %p81_p2, %p80_p1 }
   0xa   :  { %p83_p4 = pnand %p82_p3, %p76_p0 }
  0x7d   :  { %v21_v4 = vpop.permute.xlu0 %20 }
  0x7e   :  { %vm22_vm0 = vcmp.eq.s32.totalorder %v15_v3, %v21_v4 }
  0x7f   :  { %v23_v7 = vsel %vm22_vm0, 0.9, %v98_v6 }
  0x80   :  { %v24_v8 = vmul.f32 %v23_v7, %v12_v5 }
  0x82   :  { %v26_v9 = vsel %vm25_vm1, %v24_v8, 0.0 }
  0x83   :  { %27 = vadd.xlane.f32.xlu0 %v26_v9 }
 0x10c   :  { %v28_v10 = vpop.xlane.xlu0 %27 }
 0x10d   :  { %v29_v11 = vrot.slane %v28_v10, 4 }
 0x10f   :  { %v30_v12 = vadd.f32 %v29_v11, %v28_v10 }
 0x111   :  { %v31_v13 = vrot.slane %v30_v12, 2 }
 0x113   :  { %v32_v14 = vadd.f32 %v31_v13, %v30_v12 }
 0x115   :  { %v33_v15 = vrot.slane %v32_v14, 1 }
 0x117   :  { %v34_v16 = vadd.f32 %v33_v15, %v32_v14 }
 0x119   :  { %69 = vpush %v34_v16 }
 0x14a   :  { %s70_s13 = spop %69 }
 0x14b   :  { %v41_v18 = vstv %s70_s13 }
 0x14c   :  { %v42_v19 = vsel %vm40_vm4, %v41_v18, 0.0 }
 0x14d   :  { %47 = vst [vmem:[#allocation2] sm:$0xff] %v42_v19 }
 0x14e   :  { %86 = shalt.err (!%p83_p4)
}
 0x14f   :  { %64 = dma.vmem_to_hbm [thread:$0]  %s62_s0, 128, %s126_s2, [#allocation3]  }
 0x150   :  { %95 = dma.done.wait [#allocation3], 128  }
 0x151   :  { %96 = vsyncadd [#allocation3], 4294967168 }
 0x152   :  { %68 = vsyncpa [#allocation3], 1 }

</bundles_post_ra>
